<compile_context>
chip_gen: v7x
topology: tpu7x:2x2x1
jax: 0.10.0
libtpu: 0.0.40
codegen_flags: <defaults>
</compile_context>

<pallas_src>
import functools

import jax
import jax.numpy as jnp
from jax import lax
from jax.experimental import pallas as pl
from jax.experimental.pallas import tpu as pltpu

H = 64          # hidden width of FC_tiny's encoder
_MAX_TB = 8192  # upper bound on the batch tile (amortizes ~0.35us/step overhead)


def _round_up(n, m):
    return ((n + m - 1) // m) * m


def _vmem_budgets():
    """(scoped vmem limit, double-buffered x budget, w1 budget) per generation."""
    phys = 64 * 1024 * 1024  # conservative default: v7x-class (64 MiB physical)
    try:
        phys = int(getattr(pltpu.get_tpu_info(), "vmem_capacity_bytes", phys))
    except Exception:        # query unavailable -> keep the safe default
        pass
    if phys >= 100 * 1024 * 1024:   # v5e / v6e: 128 MiB physical VMEM
        return 64 * 1024 * 1024, 32 * 1024 * 1024, 16 * 1024 * 1024
    return 32 * 1024 * 1024, 12 * 1024 * 1024, 8 * 1024 * 1024


def _choose_tb(batch, tk, itemsize, x_budget_bytes):
    """Batch-tile rows: as large as the double-buffered x slab allows."""
    b8 = _round_up(max(batch, 1), 8)
    if b8 <= 512:
        return b8                      # single small tile; launch-overhead bound
    cap = x_budget_bytes // (2 * tk * itemsize)
    cap = min(max(128, (cap // 128) * 128), _MAX_TB)
    # At least two batch tiles so the "parallel" batch axis feeds both v7x cores.
    half = _round_up((b8 + 1) // 2, 128)
    return max(128, min(cap, half))


def _fc_tiny_kernel(x_ref, w1_ref, b1_ref, w2_ref, b2_ref, o_ref, acc_ref,
                    *, feat, tk):
    k = pl.program_id(1)

    @pl.when(k == 0)
    def _():
        acc_ref[...] = jnp.zeros_like(acc_ref)

    x_blk = x_ref[...]
    if feat % tk != 0:  # static: only emitted when the K axis is ragged
        # Zero out-of-range columns of the last K block so stale VMEM data
        # cannot contaminate the accumulation (w1 is zero-padded wrapper-side).
        col = lax.broadcasted_iota(jnp.int32, x_blk.shape, 1)
        x_blk = jnp.where(k * tk + col < feat, x_blk, 0).astype(x_blk.dtype)

    # Layer 1 partial product on the MXU, f32 accumulation in VMEM scratch.
    acc_ref[...] += jnp.dot(x_blk, w1_ref[...],
                            preferred_element_type=jnp.float32)

    @pl.when(k == pl.num_programs(1) - 1)
    def _():
        # Bias + ReLU on the VPU.  Dropout(0.2) is identity at inference.
        # TODO(synk): training-mode dropout would need pltpu.prng_seed +
        # pltpu.prng_random_bits to build a keep-mask plus a 1/0.8 rescale.
        h = jnp.maximum(acc_ref[...] + b1_ref[...], 0.0)
        # Layer 2: contract the hidden axes of (1, H) and (TB, H) -> (1, TB).
        # The result is lane-dense (TB along lanes) so the store is an
        # unmasked vst instead of a masked (TB, 1) column store.
        y = lax.dot_general(
            w2_ref[...], h,
            dimension_numbers=(((1,), (1,)), ((), ())),
            preferred_element_type=jnp.float32)
        o_ref[...] = (y + b2_ref[0, 0]).astype(o_ref.dtype)


def fc_tiny_forward(x, w1, b1, w2, b2):
    """x: (B, F); w1: (F, 64); b1: (1, 64); w2: (1, 64); b2: (1, 1)."""
    B, F = x.shape
    assert w1.shape == (F, H) and b1.shape == (1, H)
    assert w2.shape == (1, H) and b2.shape == (1, 1)

    # Stream x in the dtype it arrives in; only the tiny (resident) w1 is cast
    # to match a bf16 x.  No standalone wrapper cast of x (extra HBM pass).
    w1_in = w1.astype(jnp.bfloat16) if x.dtype == jnp.bfloat16 else w1
    itemsize = jnp.dtype(x.dtype).itemsize

    vmem_limit, x_budget, w_budget = _vmem_budgets()

    # K (feature) tiling: keep w1 VMEM-resident when it fits, otherwise tile
    # the contraction axis (trailing "arbitrary" grid dim + f32 accumulator).
    if 2 * F * H * itemsize <= w_budget:
        tk = F
    else:
        tk = max(128, (w_budget // (2 * H * itemsize) // 128) * 128)
    num_k = pl.cdiv(F, tk)
    f_pad = num_k * tk
    if f_pad != F:
        # Pad only the small weight matrix (never x) so ragged K blocks of w1
        # contribute exact zeros.
        w1_in = jnp.pad(w1_in, ((0, f_pad - F), (0, 0)))

    tb = _choose_tb(B, tk, itemsize, x_budget)
    num_b = pl.cdiv(B, tb)
    b_pad = num_b * tb

    # VMEM sanity check.  NOTE: single-buffering the constant-index w1/b1/w2
    # specs (pipeline_mode=pl.Buffered(1)) would reclaim tk*H*itemsize when
    # broadly supported; the budgets below already leave that headroom.
    est_vmem = (2 * tb * tk * itemsize      # double-buffered x tile
                + 2 * tk * H * itemsize     # w1 tile (double-buffered)
                + 2 * tb * H * 4            # f32 accumulator + h intermediate
                + 2 * tb * 4                # double-buffered output row
                + 64 * 1024)                # b1/w2/b2 tiles + internal scratch
    assert est_vmem <= vmem_limit, (
        f"FC_tiny kernel: tb={tb}, tk={tk} needs ~{est_vmem / 2**20:.1f} MiB "
        f"VMEM (> {vmem_limit / 2**20:.0f} MiB limit).")

    cost = pl.CostEstimate(
        flops=2 * B * F * H + 2 * B * H,
        transcendentals=0,
        bytes_accessed=(B * F * itemsize + f_pad * H * itemsize
                        + 2 * H * 4 + 4 + b_pad * 4),
    )

    call = pl.pallas_call(
        functools.partial(_fc_tiny_kernel, feat=F, tk=tk),
        out_shape=jax.ShapeDtypeStruct((1, b_pad), jnp.float32),
        grid=(num_b, num_k),
        in_specs=[
            pl.BlockSpec((tb, tk), lambda i, k: (i, k)),   # streamed x tiles
            pl.BlockSpec((tk, H), lambda i, k: (k, 0)),    # w1 (resident if 1 K tile)
            pl.BlockSpec((1, H), lambda i, k: (0, 0)),     # b1
            pl.BlockSpec((1, H), lambda i, k: (0, 0)),     # w2 row
            pl.BlockSpec(memory_space=pltpu.MemorySpace.SMEM),  # scalar b2
        ],
        out_specs=pl.BlockSpec((1, tb), lambda i, k: (0, i)),   # lane-dense row
        scratch_shapes=[pltpu.VMEM((tb, H), jnp.float32)],
        compiler_params=pltpu.CompilerParams(
            dimension_semantics=("parallel", "arbitrary"),
            vmem_limit_bytes=vmem_limit,
        ),
        cost_estimate=cost,
    )

    try:
        # Primary path: no padding of x.  Ragged last batch/K blocks are
        # handled by Pallas; out-of-range rows land in output lanes >= B and
        # are sliced off below, ragged K columns are masked in-kernel.
        out_row = call(x, w1_in, b1, w2, b2)
    except Exception:
        # Compatibility fallback for Pallas builds without ragged-block
        # support (costs one extra HBM pass over x).
        x_pad = jnp.pad(x, ((0, b_pad - B), (0, f_pad - F)))
        out_row = call(x_pad, w1_in, b1, w2, b2)

    return out_row[0, :B].reshape(B, 1).astype(x.dtype)


def init_params(key, in_features, hidden=H):
    """Deterministic init mimicking torch.nn.Linear (U(-1/sqrt(fan_in), +))."""
    k1, k2, k3, k4 = jax.random.split(key, 4)
    bound1 = 1.0 / jnp.sqrt(in_features)
    bound2 = 1.0 / jnp.sqrt(hidden)
    w1 = jax.random.uniform(k1, (in_features, hidden), jnp.float32,
                            -bound1, bound1)
    b1 = jax.random.uniform(k2, (1, hidden), jnp.float32, -bound1, bound1)
    w2 = jax.random.uniform(k3, (1, hidden), jnp.float32, -bound2, bound2)
    b2 = jax.random.uniform(k4, (1, 1), jnp.float32, -bound2, bound2)
    return w1, b1, w2, b2


def _reference(x, w1, b1, w2, b2):
    h = jnp.maximum(
        jnp.dot(x, w1, precision=jax.lax.Precision.HIGHEST) + b1, 0.0)
    return jnp.dot(h, w2.T, precision=jax.lax.Precision.HIGHEST) + b2


if __name__ == "__main__":
    key = jax.random.PRNGKey(0)
    k_x, k_p, k_x2 = jax.random.split(key, 3)

    # Small demo shape consistent with the module: batch=8, in_features=32.
    B, F = 8, 32
    x = jax.random.normal(k_x, (B, F), jnp.float32)
    w1, b1, w2, b2 = init_params(k_p, F)

    out = jax.block_until_ready(fc_tiny_forward(x, w1, b1, w2, b2))
    ref = _reference(x, w1, b1, w2, b2)
    assert out.shape == (B, 1)
    assert jnp.allclose(out, ref, atol=1e-4, rtol=1e-4)

    # Multi-tile path with a ragged last batch block (no wrapper-side x pad).
    B2 = 1500
    x2 = jax.random.normal(k_x2, (B2, F), jnp.float32)
    out2 = jax.block_until_ready(fc_tiny_forward(x2, w1, b1, w2, b2))
    ref2 = _reference(x2, w1, b1, w2, b2)
    assert out2.shape == (B2, 1)
    assert jnp.allclose(out2, ref2, atol=1e-4, rtol=1e-4)

    print("KERNEL_OK")
</pallas_src>

<mosaic_0001>
module attributes {stable_mosaic.version = 11 : i64} {
  func.func @_fc_tiny_kernel(%arg0: i32, %arg1: i32, %arg2: memref<8x32xf32, #tpu.memory_space<vmem>>, %arg3: memref<32x64xf32, #tpu.memory_space<vmem>>, %arg4: memref<1x64xf32, #tpu.memory_space<vmem>>, %arg5: memref<1x64xf32, #tpu.memory_space<vmem>>, %arg6: memref<1x1xf32, #tpu.memory_space<smem>>, %arg7: memref<1x8xf32, #tpu.memory_space<vmem>>, %arg8: memref<8x64xf32, #tpu.memory_space<vmem>>) attributes {dimension_semantics = [#tpu.dimension_semantics<parallel>, #tpu.dimension_semantics<arbitrary>], iteration_bounds = array<i64: 1, 1>, scalar_prefetch = 0 : i64, scratch_operands = 1 : i64, tpu.core_type = #tpu.core_type<tc>, window_params = [{transform_indices = @transform_0, window_bounds = array<i64: 8, 32>}, {transform_indices = @transform_1, window_bounds = array<i64: 32, 64>}, {pipeline_mode = #tpu.pipeline_mode<synchronous>, transform_indices = @transform_2, window_bounds = array<i64: 1, 64>}, {pipeline_mode = #tpu.pipeline_mode<synchronous>, transform_indices = @transform_3, window_bounds = array<i64: 1, 64>}, {transform_indices = @transform_4, window_bounds = array<i64: 1, 1>}, {transform_indices = @transform_5, window_bounds = array<i64: 1, 8>}]} {
    %c0_i32 = arith.constant 0 : i32
    %0 = arith.cmpi eq, %arg1, %c0_i32 : i32
    %1 = arith.extui %0 : i1 to i32
    %c0_i32_0 = arith.constant 0 : i32
    %2 = arith.cmpi ne, %1, %c0_i32_0 : i32
    scf.if %2 {
      %cst_10 = arith.constant 0.000000e+00 : f32
      %12 = vector.broadcast %cst_10 : f32 to vector<8x64xf32>
      %c0_11 = arith.constant 0 : index
      %c0_12 = arith.constant 0 : index
      %13 = vector.load %arg8[%c0_11, %c0_12] : memref<8x64xf32, #tpu.memory_space<vmem>>, vector<8x64xf32>
      tpu.vector_store %arg8[%c0_11, %c0_12], %12 {strides = array<i32>} : memref<8x64xf32, #tpu.memory_space<vmem>>, vector<8x64xf32>,
    } else {
    }
    %c0 = arith.constant 0 : index
    %c0_1 = arith.constant 0 : index
    %3 = vector.load %arg2[%c0, %c0_1] : memref<8x32xf32, #tpu.memory_space<vmem>>, vector<8x32xf32>
    %c0_2 = arith.constant 0 : index
    %c0_3 = arith.constant 0 : index
    %4 = vector.load %arg8[%c0_2, %c0_3] : memref<8x64xf32, #tpu.memory_space<vmem>>, vector<8x64xf32>
    %c0_4 = arith.constant 0 : index
    %c0_5 = arith.constant 0 : index
    %5 = vector.load %arg3[%c0_4, %c0_5] : memref<32x64xf32, #tpu.memory_space<vmem>>, vector<32x64xf32>
    %cst = arith.constant dense<0.000000e+00> : vector<8x64xf32>
    %6 = tpu.matmul %3, %5, %cst {dimension_numbers = #tpu.dot_dimension_numbers<[1], [0], [0], [1], [0, 0, 1, 1], [], []>} : vector<8x32xf32>, vector<32x64xf32>, vector<8x64xf32> -> vector<8x64xf32>
    %7 = arith.addf %4, %6 : vector<8x64xf32>
    %c0_6 = arith.constant 0 : index
    %c0_7 = arith.constant 0 : index
    %8 = vector.load %arg8[%c0_6, %c0_7] : memref<8x64xf32, #tpu.memory_space<vmem>>, vector<8x64xf32>
    tpu.vector_store %arg8[%c0_6, %c0_7], %7 {strides = array<i32>} : memref<8x64xf32, #tpu.memory_space<vmem>>, vector<8x64xf32>,
    %c0_i32_8 = arith.constant 0 : i32
    %9 = arith.cmpi eq, %arg1, %c0_i32_8 : i32
    %10 = arith.extui %9 : i1 to i32
    %c0_i32_9 = arith.constant 0 : i32
    %11 = arith.cmpi ne, %10, %c0_i32_9 : i32
    scf.if %11 {
      %c0_10 = arith.constant 0 : index
      %c0_11 = arith.constant 0 : index
      %12 = vector.load %arg8[%c0_10, %c0_11] : memref<8x64xf32, #tpu.memory_space<vmem>>, vector<8x64xf32>
      %c0_12 = arith.constant 0 : index
      %c0_13 = arith.constant 0 : index
      %13 = vector.load %arg4[%c0_12, %c0_13] : memref<1x64xf32, #tpu.memory_space<vmem>>, vector<1x64xf32>
      %14 = vector.broadcast %13 : vector<1x64xf32> to vector<8x64xf32>
      %15 = arith.addf %12, %14 : vector<8x64xf32>
      %cst_14 = arith.constant 0.000000e+00 : f32
      %16 = vector.broadcast %cst_14 : f32 to vector<8x64xf32>
      %17 = arith.maximumf %15, %16 : vector<8x64xf32>
      %c0_15 = arith.constant 0 : index
      %c0_16 = arith.constant 0 : index
      %18 = vector.load %arg5[%c0_15, %c0_16] : memref<1x64xf32, #tpu.memory_space<vmem>>, vector<1x64xf32>
      %cst_17 = arith.constant dense<0.000000e+00> : vector<1x8xf32>
      %19 = tpu.matmul %18, %17, %cst_17 {dimension_numbers = #tpu.dot_dimension_numbers<[1], [1], [0], [0], [0, 0, 1, 0], [], []>} : vector<1x64xf32>, vector<8x64xf32>, vector<1x8xf32> -> vector<1x8xf32>
      %c0_18 = arith.constant 0 : index
      %c0_19 = arith.constant 0 : index
      %20 = memref.load %arg6[%c0_18, %c0_19] : memref<1x1xf32, #tpu.memory_space<smem>>
      %21 = vector.broadcast %20 : f32 to vector<1x8xf32>
      %22 = arith.addf %19, %21 : vector<1x8xf32>
      %c0_20 = arith.constant 0 : index
      %c0_21 = arith.constant 0 : index
      %23 = vector.load %arg7[%c0_20, %c0_21] : memref<1x8xf32, #tpu.memory_space<vmem>>, vector<1x8xf32>
      tpu.vector_store %arg7[%c0_20, %c0_21], %22 {strides = array<i32>} : memref<1x8xf32, #tpu.memory_space<vmem>>, vector<1x8xf32>,
    } else {
    }
    return
  }
  func.func @transform_0(%arg0: i32, %arg1: i32) -> (i32, i32) {
    %c0_i32 = arith.constant 0 : i32
    return %arg0, %arg1 : i32, i32
  }
  func.func @transform_1(%arg0: i32, %arg1: i32) -> (i32, i32) {
    %c0_i32 = arith.constant 0 : i32
    %c0_i32_0 = arith.constant 0 : i32
    return %arg1, %c0_i32 : i32, i32
  }
  func.func @transform_2(%arg0: i32, %arg1: i32) -> (i32, i32) {
    %c0_i32 = arith.constant 0 : i32
    %c0_i32_0 = arith.constant 0 : i32
    %c0_i32_1 = arith.constant 0 : i32
    return %c0_i32, %c0_i32_0 : i32, i32
  }
  func.func @transform_3(%arg0: i32, %arg1: i32) -> (i32, i32) {
    %c0_i32 = arith.constant 0 : i32
    %c0_i32_0 = arith.constant 0 : i32
    %c0_i32_1 = arith.constant 0 : i32
    return %c0_i32, %c0_i32_0 : i32, i32
  }
  func.func @transform_4(%arg0: i32, %arg1: i32) -> (i32, i32) {
    %c0_i32 = arith.constant 0 : i32
    %c0_i32_0 = arith.constant 0 : i32
    %c0_i32_1 = arith.constant 0 : i32
    return %c0_i32, %c0_i32_0 : i32, i32
  }
  func.func @transform_5(%arg0: i32, %arg1: i32) -> (i32, i32) {
    %c0_i32 = arith.constant 0 : i32
    %c0_i32_0 = arith.constant 0 : i32
    return %c0_i32, %arg0 : i32, i32
  }
}

</mosaic_0001>

<bundles_post_ra>
// kernel: tpu_custom_call.1
= control target key start
LH: loop header
LB: loop body
LE: loop exit
PB: predicated region body
PF: predicated region fallthrough
CT: control target
= control target key end

     0   :  { %11 = vsyncpa [#allocation5], 0  ;;  %s454_s0 = inlined_call_operand.hbm [shape: f32[8,32], index: 0, kind: input, shape index: {}]   ;;  %s455_s1 = inlined_call_operand.hbm [shape: f32[32,64], index: 1, kind: input, shape index: {}]   ;;  %s456_s2 = inlined_call_operand.vmem [shape: f32[1,64], index: 2, kind: input, shape index: {}]   ;;  %s457_s3 = inlined_call_operand.vmem [shape: f32[1,64], index: 3, kind: input, shape index: {}]   ;;  %s458_s4 = inlined_call_operand.<no memory space> [shape: f32[1,1], index: 4, kind: input, shape index: {}]   ;;  %s459_s5 = inlined_call_operand.hbm [shape: f32[1,8], index: 5, kind: output, shape index: {}]  }
   0x1   :  { %12 = vsyncpa [#allocation8], 0 }
   0x2   :  { %13 = vsyncpa [#allocation6], 0  ;;  %s360_s18 = smov [#allocation4]   ;;  %s361_s20 = smov [#allocation7]  }
   0x3   :  { %s20_s19 = sshll.u32 %s360_s18, 4  ;;  %s29_s21 = sshll.u32 %s361_s20, 4  ;;  %s21_s19 = int_to_ptr.vmem [resolvable:$true] %s20_s19  ;;  %s398_s21 = int_to_ptr.vmem [resolvable:$true] %s29_s21 }
   0x4   :  { %s288_s24 = scalar_lea.hbm %s454_s0, 128 }
   0x5   :  { %p289_p0 = scmp.ne.s32.totalorder %s454_s0, %s288_s24  ;;  %p292_p1 = scmp.lt.u32.totalorder %s288_s24, %s454_s0 }
   0x7   :  { %p294_p2 = pnand %p292_p1, %p289_p0 }
   0x9   :  { %297 = shalt.err (!%p294_p2)
}
   0xa   :  { %s298_s29 = scalar_lea.vmem %s21_s19, 128  ;;  %p303_p4 = scmp.lt.s32.totalorder %s21_s19, %s21_s19 }
   0xb   :  { %p299_p3 = scmp.ne.s32.totalorder %s21_s19, %s298_s29  ;;  %p304_p5 = scmp.lt.s32.totalorder %s298_s29, %s298_s29 }
   0xd   :  { %p305_p6 = por %p304_p5, %p303_p4 }
   0xf   :  { %p306_p7 = pnand %p305_p6, %p299_p3 }
  0x11   :  { %309 = shalt.err (!%p306_p7)
}
  0x12   :  { %23 = dma.hbm_to_vmem [thread:$0]  %s454_s0, 128, %s21_s19, [#allocation5]  }
  0x13   :  { %s310_s9 = scalar_lea.hbm %s455_s1, 512 }
  0x14   :  { %p311_p8 = scmp.ne.s32.totalorder %s455_s1, %s310_s9  ;;  %p314_p9 = scmp.lt.u32.totalorder %s310_s9, %s455_s1 }
  0x16   :  { %p316_p10 = pnand %p314_p9, %p311_p8 }
  0x18   :  { %319 = shalt.err (!%p316_p10)
}
  0x19   :  { %s320_s14 = scalar_lea.vmem %s398_s21, 512  ;;  %p325_p12 = scmp.lt.s32.totalorder %s398_s21, %s398_s21 }
  0x1a   :  { %p321_p11 = scmp.ne.s32.totalorder %s398_s21, %s320_s14  ;;  %p326_p13 = scmp.lt.s32.totalorder %s320_s14, %s320_s14 }
  0x1c   :  { %p327_p0 = por %p326_p13, %p325_p12 }
  0x1e   :  { %p328_p1 = pnand %p327_p0, %p321_p11 }
  0x20   :  { %331 = shalt.err (!%p328_p1)
}
  0x21   :  { %s362_s0 = smov 128   ;;  %s363_s15 = smov 8  }
  0x22   :  { %35 = dma.hbm_to_vmem [thread:$0]  %s455_s1, 512, %s398_s21, [#allocation8], %s362_s0, %s362_s0, %s363_s15  }
  0x23   :  { %354 = dma.done.wait [#allocation5], 128  }
  0x24   :  { %355 = vsyncadd [#allocation5], 4294967168 }
  0x25   :  { %356 = dma.done.wait [#allocation8], 512  }
  0x26   :  { %357 = vsyncadd [#allocation8], 4294966784  ;;  %v364_v0 = vmov 0.0|0.0   ;;  %vm365_vm0 = vmmov 0   ;;  %v366_v1 = vmov 0.0   ;;  %vm52_vm1 = vcmask 523264  }
  0x27   :  { %274 = vmatprep.subr.bf16.mxu0 %v364_v0  ;;  %266 = vmatprep.mubr.msk.f32.mxu0 %vm365_vm0, %v366_v1  ;;  %53 = vst.msk [vmem:[#allocation2] sm:$0xff] %vm52_vm1, %v366_v1  ;;  %v56_v2 = vld [vmem:[#allocation7] sm:$0xff]  ;;  %v57_v3 = vld [vmem:[#allocation7 + $0x8] sm:$0xff]  ;;  %v58_v4 = vld [vmem:[#allocation7 + $0x10] sm:$0xff]  ;;  %vm60_vm2 = vcmask 261120   ;;  %v152_v18 = vstv %s458_s4  ;;  %s367_s23 = smov [#allocation9]  }
  0x28   :  { %269 = vmatprep.subr.mxu1 %v366_v1  ;;  %271 = vmatprep.mubr.msk.f32.mxu1 %vm365_vm0, %v366_v1  ;;  %v275_v5 = vpack.c.bf16 %v57_v3, %v56_v2  ;;  %v59_v6 = vld [vmem:[#allocation7 + $0x18] sm:$0xff]  ;;  %v248_v13 = vld [vmem:[%s456_s2] ss:$0 sm:$0xff]  ;;  %s237_s24 = sshll.u32 %s367_s23, 4  ;;  %vm229_vm3 = vcmask 57344   ;;  %s238_s24 = int_to_ptr.vmem [resolvable:$true] %s237_s24 }
  0x29   :  { %v278_v7 = vpack.c.bf16 %v59_v6, %v58_v4  ;;  %v54_v8 = vld [vmem:[#allocation4] sm:$0xff]  ;;  %v150_v17 = vld [vmem:[%s457_s3] sm:$0x1]  ;;  %s332_s2 = scalar_lea.vmem %s238_s24, 16  ;;  %s336_s25 = scalar_lea.vmem %s238_s24, 32 }
  0x2a   :  { %276 = vmatpush3.bf16.msra.mxu0 %v275_v5  ;;  %p333_p2 = scmp.ne.s32.totalorder %s238_s24, %s332_s2  ;;  %p337_p3 = scmp.lt.s32.totalorder %s238_s24, %s238_s24 }
  0x2b   :  { %277 = vmatprep.subr.bf16.mxu0 %v364_v0  ;;  %p338_p4 = scmp.lt.s32.totalorder %s336_s25, %s332_s2 }
  0x2d   :  { %p339_p5 = por %p338_p4, %p337_p3 }
  0x2e   :  { %279 = vmatpush3.bf16.msra.mxu0 %v278_v7  ;;  %v55_v9 = vld [vmem:[#allocation2] sm:$0xff] }
  0x2f   :  { %p340_p6 = pnand %p339_p5, %p333_p2 }
  0x31   :  { %267 = vmatmul.mubr.msk.f32.vlgmr.msra.gmra.mrb[0].mxu0 %vm60_vm2, %v54_v8 }
 0x104   :  { %v130_v10 = vpop.f32.mrb[0].mxu0 }
 0x105   :  { %v134_v11 = vadd.f32 %v130_v10, %v55_v9  ;;  %v268_v12 = vpop.f32.mrb[1].mxu0 }
 0x107   :  { %136 = vst.msk [vmem:[#allocation2] sm:$0xff] %vm52_vm1, %v134_v11 }
 0x10e   :  { %v140_v14 = vld [vmem:[#allocation2] sm:$0xff] }
 0x10f   :  { %v148_v15 = vadd.f32 %v248_v13, %v140_v14 }
 0x111   :  { %v149_v16 = vmax.f32 %v148_v15, 0.0 }
 0x113   :  { %270 = vmatpush3.xpose.msk.msra.mxu1 %vm52_vm1, %v149_v16 }
 0x116   :  { %272 = vmatmul.mubr.msk.f32.vlgmr.msra.gmra.mrb[0].mxu1 %vm52_vm1, %v150_v17 }
 0x1e9   :  { %v225_v19 = vpop.f32.mrb[0].mxu1 }
 0x1ea   :  { %v226_v20 = vadd.f32 %v225_v19, %v152_v18  ;;  %v273_v21 = vpop.f32.mrb[1].mxu1 }
 0x1ec   :  { %230 = vst.msk [vmem:[#allocation9] sm:$0x1] %vm229_vm3, %v226_v20 }
 0x1ed   :  { %343 = shalt.err (!%p340_p6)
}
 0x1ee   :  { %s344_s4 = scalar_lea.hbm %s459_s5, 16 }
 0x1ef   :  { %p345_p7 = scmp.ne.s32.totalorder %s459_s5, %s344_s4  ;;  %p348_p8 = scmp.lt.u32.totalorder %s344_s4, %s459_s5 }
 0x1f1   :  { %p350_p9 = pnand %p348_p8, %p345_p7 }
 0x1f3   :  { %353 = shalt.err (!%p350_p9)
}
 0x1f4   :  { %240 = dma.vmem_to_hbm [thread:$0]  %s238_s24, 16, %s459_s5, [#allocation6]  }
 0x1f5   :  { %358 = dma.done.wait [#allocation6], 16  }
 0x1f6   :  { %359 = vsyncadd [#allocation6], 4294967280 }
 0x1f7   :  { %244 = vsyncpa [#allocation5], 1 }
 0x1f8   :  { %245 = vsyncpa [#allocation8], 1 }
 0x1f9   :  { %246 = vsyncpa [#allocation6], 1 }

</bundles_post_ra>
